<compile_context>
chip_gen: v7x
topology: tpu7x:2x2x1
jax: 0.10.0
libtpu: 0.0.40
codegen_flags: <defaults>
</compile_context>

<pallas_src>
import jax
import jax.numpy as jnp
from jax import lax
from jax.experimental import pallas as pl
from jax.experimental.pallas import tpu as pltpu


def _round_up(x, m):
    return ((x + m - 1) // m) * m


# ----------------------------------------------------------------------------
# Pallas kernel: batched row gather from a VMEM-resident table.
# ----------------------------------------------------------------------------
def _gather_block_kernel(idx_ref, w_ref, out_ref):
    """Gather `tm` rows of the resident table into one dense output block.

    idx_ref : SMEM scalar-prefetch, (M_pad,) int32 row ids.
    w_ref   : (num_rel, D) float32 weight table, VMEM-resident (block index
              is constant across the grid so it is DMA'd in once).
    out_ref : (tm, D) float32 output block for this grid step.
    """
    i = pl.program_id(0)
    tm = out_ref.shape[0]

    def body(r, carry):
        rel = idx_ref[i * tm + r]                       # scalar read from SMEM
        out_ref[pl.ds(r, 1), :] = w_ref[pl.ds(rel, 1), :]
        return carry

    lax.fori_loop(0, tm, body, 0)


def embedding_gather(weight, flat_idx, block_rows=256):
    """Gather rows of `weight` at `flat_idx`.

    weight:   (num_rel, D) float32 embedding table.
    flat_idx: (M,) int32 relation ids.
    returns:  (M, D) float32 gathered rows.
    """
    M = int(flat_idx.shape[0])
    num_rel, D = weight.shape

    # Dense output row-block: multiple of 8 sublanes, many lookups per step.
    tm = min(block_rows, _round_up(M, 8))
    tm = _round_up(tm, 8)
    num_blocks = -(-M // tm)
    m_pad = num_blocks * tm

    # Pad indices so the last block's in-kernel SMEM reads stay in bounds.
    idx = jnp.pad(flat_idx.astype(jnp.int32), (0, m_pad - M))

    # Explicit VMEM budget: resident table + double-buffered (tm, D) output.
    table_bytes = num_rel * D * 4
    out_bytes = tm * D * 4
    vmem_limit = max(16 << 20, 2 * table_bytes + 2 * out_bytes + (1 << 20))
    vmem_limit = min(vmem_limit, 64 << 20)
    # TODO(synk): for tables too large to be VMEM-resident (e.g. >32K rows on
    # v7x), fall back to a data-dependent per-row BlockSpec gather with a
    # deeper pl.Buffered pipeline instead of the resident-table path.

    out = pl.pallas_call(
        _gather_block_kernel,
        out_shape=jax.ShapeDtypeStruct((m_pad, D), weight.dtype),
        grid_spec=pltpu.PrefetchScalarGridSpec(
            num_scalar_prefetch=1,
            grid=(num_blocks,),
            in_specs=[
                # Whole table resident in VMEM; constant block index -> the
                # pipeline fetches it once and reuses it across grid steps.
                pl.BlockSpec((num_rel, D), lambda i, idx_ref: (0, 0)),
            ],
            out_specs=pl.BlockSpec((tm, D), lambda i, idx_ref: (i, 0)),
        ),
        compiler_params=pltpu.CompilerParams(
            dimension_semantics=("parallel",),
            vmem_limit_bytes=vmem_limit,
        ),
    )(idx, weight)
    return out[:M]


# ----------------------------------------------------------------------------
# JAX/Python port of the module (glue: rel2id mapping, weight init, reshapes).
# ----------------------------------------------------------------------------
class REmbeddingPallas:
    def __init__(self, dataset, parameter):
        self.es = parameter["embed_dim"]
        self.rel2id = dataset["rel2id"]
        num_rel = len(self.rel2id)
        # Deterministic init: every relation row = flattened identity(es).
        identity = jnp.eye(self.es, dtype=jnp.float32).reshape(self.es * self.es)
        self.weight = jnp.tile(identity[None, :], (num_rel, 1))  # (num_rel, es*es)

    def forward(self, triples):
        # rel_emb indices: [[[rel2id[t[1]]] for t in batch] for batch in triples]
        idx = [[[self.rel2id[t[1]]] for t in batch] for batch in triples]
        idx = jnp.asarray(idx, dtype=jnp.int32)          # (B, N, 1)
        B, N, one = idx.shape
        flat_idx = idx.reshape(B * N * one)
        out = embedding_gather(self.weight, flat_idx)    # (B*N*1, es*es)
        return out.reshape(B, N, one, self.es * self.es)  # (B, N, 1, es*es)


if __name__ == "__main__":
    # Small deterministic setup consistent with the module.
    embed_dim = 16                       # es -> rows of size es*es = 256
    rel_names = ["rel_a", "rel_b", "rel_c", "rel_d"]
    dataset = {"rel2id": {r: i for i, r in enumerate(rel_names)}}
    parameter = {"device": None, "embed_dim": embed_dim}

    model = REmbeddingPallas(dataset, parameter)

    # Build triples: batch=2, 8 triples each; relations chosen deterministically
    # via jax.random.PRNGKey(0).
    B, N = 2, 8
    key = jax.random.PRNGKey(0)
    rel_ids = jax.random.randint(key, (B, N), 0, len(rel_names))
    rel_ids_host = jax.device_get(rel_ids)
    triples = [
        [("h%d_%d" % (b, n), rel_names[int(rel_ids_host[b, n])], "t%d_%d" % (b, n))
         for n in range(N)]
        for b in range(B)
    ]

    out = model.forward(triples)
    out = jax.block_until_ready(out)

    # Reference check against plain JAX embedding lookup (module semantics).
    idx_ref = jnp.asarray(
        [[[dataset["rel2id"][t[1]]] for t in batch] for batch in triples],
        dtype=jnp.int32)
    ref = jnp.take(model.weight, idx_ref.reshape(-1), axis=0).reshape(
        B, N, 1, embed_dim * embed_dim)

    assert out.shape == (B, N, 1, embed_dim * embed_dim), out.shape
    assert out.dtype == jnp.float32
    assert bool(jnp.allclose(out, ref)), "mismatch vs reference gather"

    # Extra index-correctness check with a NON-constant table (the identity-
    # tiled module table would hide wrong indices).
    rand_table = jax.random.normal(
        jax.random.PRNGKey(1),
        (len(rel_names), embed_dim * embed_dim)).astype(jnp.float32)
    flat = idx_ref.reshape(-1)
    got = jax.block_until_ready(embedding_gather(rand_table, flat))
    want = jnp.take(rand_table, flat, axis=0)
    assert bool(jnp.allclose(got, want)), "mismatch vs reference gather (random table)"

    print("KERNEL_OK")
</pallas_src>

<mosaic_0001>
module attributes {stable_mosaic.version = 11 : i64} {
  func.func @_gather_block_kernel(%arg0: i32, %arg1: memref<16xi32, #tpu.memory_space<smem>>, %arg2: memref<4x256xf32, #tpu.memory_space<vmem>>, %arg3: memref<16x256xf32, #tpu.memory_space<vmem>>) attributes {dimension_semantics = [#tpu.dimension_semantics<parallel>], iteration_bounds = array<i64: 1>, scalar_prefetch = 1 : i64, scratch_operands = 0 : i64, tpu.core_type = #tpu.core_type<tc>, window_params = [{pipeline_mode = #tpu.pipeline_mode<synchronous>, transform_indices = @transform_0, window_bounds = array<i64: 4, 256>}, {transform_indices = @transform_1, window_bounds = array<i64: 16, 256>}]} {
    %c0_i32 = arith.constant 0 : i32
    %c16_i32 = arith.constant 16 : i32
    %0 = arith.addi %c0_i32, %c16_i32 : i32
    %c1_i32 = arith.constant 1 : i32
    scf.for %arg4 = %c0_i32 to %0 step %c1_i32  : i32 {
      %c16_i32_1 = arith.constant 16 : i32
      %1 = arith.muli %arg0, %c16_i32_1 : i32
      %2 = arith.addi %1, %arg4 : i32
      %3 = arith.index_cast %2 : i32 to index
      %4 = memref.load %arg1[%3] : memref<16xi32, #tpu.memory_space<smem>>
      %5 = arith.index_cast %4 : i32 to index
      %c0 = arith.constant 0 : index
      %6 = vector.load %arg2[%5, %c0] : memref<4x256xf32, #tpu.memory_space<vmem>>, vector<1x256xf32>
      %7 = arith.index_cast %arg4 : i32 to index
      %c0_2 = arith.constant 0 : index
      %8 = vector.load %arg3[%7, %c0_2] : memref<16x256xf32, #tpu.memory_space<vmem>>, vector<1x256xf32>
      tpu.vector_store %arg3[%7, %c0_2], %6 {strides = array<i32>} : memref<16x256xf32, #tpu.memory_space<vmem>>, vector<1x256xf32>,
    }
    %c16_i32_0 = arith.constant 16 : i32
    return
  }
  func.func @transform_0(%arg0: i32, %arg1: memref<16xi32, #tpu.memory_space<smem>>) -> (i32, i32) {
    %c0_i32 = arith.constant 0 : i32
    %c0_i32_0 = arith.constant 0 : i32
    %c0_i32_1 = arith.constant 0 : i32
    return %c0_i32, %c0_i32_0 : i32, i32
  }
  func.func @transform_1(%arg0: i32, %arg1: memref<16xi32, #tpu.memory_space<smem>>) -> (i32, i32) {
    %c0_i32 = arith.constant 0 : i32
    %c0_i32_0 = arith.constant 0 : i32
    return %arg0, %c0_i32 : i32, i32
  }
}

</mosaic_0001>

<bundles_post_ra>
// kernel: tpu_custom_call.1
= control target key start
LH: loop header
LB: loop body
LE: loop exit
PB: predicated region body
PF: predicated region fallthrough
CT: control target
= control target key end

     0   :  { %s229_s0 = inlined_call_operand.hbm [shape: s32[16], index: 0, kind: input, shape index: {}]   ;;  %s230_s1 = inlined_call_operand.hbm [shape: f32[4,256], index: 1, kind: input, shape index: {}]   ;;  %s231_s2 = inlined_call_operand.hbm [shape: f32[16,256], index: 2, kind: output, shape index: {}]  }
   0x1   :  { %s105_s11 = scalar_lea.hbm %s229_s0, 16 }
   0x2   :  { %p106_p0 = scmp.ne.s32.totalorder %s229_s0, %s105_s11  ;;  %p109_p1 = scmp.lt.u32.totalorder %s105_s11, %s229_s0 }
   0x4   :  { %p111_p2 = pnand %p109_p1, %p106_p0 }
   0x6   :  { %114 = shalt.err (!%p111_p2)  }
   0x7   :  { %s173_s16 = smov [#allocation3]  }
   0x8   :  { %8 = dma.hbm_to_smem %s229_s0, 16, %s173_s16, [#allocation2] }
   0x9   :  { %163 = dma.done.wait [#allocation2], 16 }
   0xa   :  { %164 = vsyncadd [#allocation2], 4294967280 }
   0xb   :  { %10 = sfence }
   0xc   :  { %11 = vsyncpa [#allocation5], 0 }
   0xd   :  { %12 = vsyncpa [#allocation6], 0  ;;  %s174_s19 = smov [#allocation4]   ;;  %s115_s23 = scalar_lea.hbm %s230_s1, 128 }
   0xe   :  { %s19_s20 = sshll.u32 %s174_s19, 4  ;;  %p116_p3 = scmp.ne.s32.totalorder %s230_s1, %s115_s23  ;;  %s20_s20 = int_to_ptr.vmem [resolvable:$true] %s19_s20 }
   0xf   :  { %p119_p4 = scmp.lt.u32.totalorder %s115_s23, %s230_s1 }
  0x11   :  { %p121_p5 = pnand %p119_p4, %p116_p3 }
  0x13   :  { %124 = shalt.err (!%p121_p5)
}
  0x14   :  { %s125_s0 = scalar_lea.vmem %s20_s20, 128  ;;  %p130_p7 = scmp.lt.s32.totalorder %s20_s20, %s20_s20 }
  0x15   :  { %p126_p6 = scmp.ne.s32.totalorder %s20_s20, %s125_s0  ;;  %p131_p8 = scmp.lt.s32.totalorder %s125_s0, %s125_s0 }
  0x17   :  { %p132_p9 = por %p131_p8, %p130_p7 }
  0x19   :  { %p133_p10 = pnand %p132_p9, %p126_p6 }
  0x1b   :  { %136 = shalt.err (!%p133_p10)
}
  0x1c   :  { %22 = dma.hbm_to_vmem [thread:$0]  %s230_s1, 128, %s20_s20, [#allocation5]  }
  0x1d   :  { %165 = dma.done.wait [#allocation5], 128  }
  0x1e   :  { %166 = vsyncadd [#allocation5], 4294967168  ;;  %s169_s30 = smov 0  }
  0x1f LB: > { %s34_s3 = sld [smem:[#allocation3 + %s171_s30]]  ;;  %s48_s4 = sshra.s32 %s171_s30, 3  ;;  %v44_v0 = vlaneseq  ;;  %s171_s30 = sphi %s169_s30, %s31_s30  }
  0x20   : > { %s51_s5 = sand.u32 7, %s171_s30  ;;  %s91_s6 = sshll.u32 %s48_s4, 4 }
  0x21   : > { %s54_s7 = sadd.s32 %s91_s6, %s51_s5  ;;  %vm46_vm0 = vcmp.lt.s32.totalorder %v44_v0, 256  ;;  %s31_s30 = sadd.s32 1, %s171_s30  }
  0x22   : > { %s55_s1 = scalar_lea.vmem [#allocation7], %s54_s7  ;;  %p28_p11 = scmp.ge.s32.totalorder %s31_s30, 16  }
  0x23   :  { %s175_s13 = smov (%p28_p11), [#allocation7]  }
  0x24   :  { %30 = sbr.rel (!%p28_p11) target bundleno = 31 (0x1f), region = 37  ;;  %s63_s14 = sshll.u32 (%p28_p11), %s175_s13, 4  ;;  %s64_s14 = int_to_ptr.vmem [resolvable:$true] %s63_s14 }
  0x25   : > { %s35_s8 = sshra.s32 %s34_s3, 2  ;;  %s38_s9 = sand.u32 3, %s34_s3 }
  0x26   : > { %s90_s10 = sshll.u32 %s35_s8, 3  ;;  %s137_s15 = scalar_lea.vmem (%p28_p11), %s64_s14, 512 }
  0x27   : > { %s41_s11 = sadd.s32 %s90_s10, %s38_s9  ;;  %p138_p12 = scmp.ne.s32.totalorder (%p28_p11), %s64_s14, %s137_s15 }
  0x28   : > { %s42_s12 = scalar_lea.vmem [#allocation4], %s41_s11  ;;  %p142_p13 = scmp.lt.s32.totalorder (%p28_p11), %s64_s14, %s64_s14 }
  0x29   : > { %v43_v1 = vld [vmem:[%s42_s12] ss:$4 sm:$0x3]  ;;  %p143_p0 = scmp.lt.s32.totalorder (%p28_p11), %s137_s15, %s137_s15 }
  0x2a   : > { %56 = vst.msk [vmem:[%s55_s1] ss:$8 sm:$0x3] %vm46_vm0, %v43_v1 }
  0x2b   :  { %p144_p1 = por %p143_p0, %p142_p13 }
  0x2d   :  { %p145_p2 = pnand %p144_p1, %p138_p12 }
  0x2f   :  { %148 = shalt.err (!%p145_p2)
}
  0x30   :  { %s149_s18 = scalar_lea.hbm %s231_s2, 512 }
  0x31   :  { %p150_p3 = scmp.ne.s32.totalorder %s231_s2, %s149_s18  ;;  %p153_p4 = scmp.lt.u32.totalorder %s149_s18, %s231_s2 }
  0x33   :  { %p155_p5 = pnand %p153_p4, %p150_p3 }
  0x35   :  { %158 = shalt.err (!%p155_p5)
}
  0x36   :  { %s176_s23 = smov 256   ;;  %s177_s24 = smov 16  }
  0x37   :  { %69 = dma.vmem_to_hbm [thread:$0]  %s64_s14, 512, %s231_s2, [#allocation6], %s176_s23, %s176_s23, %s177_s24  }
  0x38   :  { %167 = dma.done.wait [#allocation6], 512  }
  0x39   :  { %168 = vsyncadd [#allocation6], 4294966784 }
  0x3a   :  { %73 = vsyncpa [#allocation5], 1 }
  0x3b   :  { %74 = vsyncpa [#allocation6], 1 }

</bundles_post_ra>
